<compile_context>
chip_gen: v7x
topology: tpu7x:2x2x1
jax: 0.10.0
libtpu: 0.0.40
codegen_flags: <defaults>
</compile_context>

<pallas_src>
import functools

import jax
import jax.numpy as jnp
from jax import lax
from jax.experimental import pallas as pl
from jax.experimental.pallas import tpu as pltpu


_LANE = 128
_SUBLANE = 8
_MAX_TILE_S = 2048          # beyond this the ~0.35us/step grid overhead is noise


def _round_up(n, m):
    return (n + m - 1) // m * m


def _cdiv(a, b):
    return -(-a // b)


def _vmem_budget():
    """Scoped-VMEM budget: ~3/4 of the chip's VMEM, capped at 96 MiB."""
    try:
        phys = int(pltpu.get_tpu_info().vmem_capacity_bytes)
    except Exception:
        phys = 64 * 1024 * 1024     # conservative fallback (v7x-sized VMEM)
    return max(16 * 1024 * 1024, min(phys * 3 // 4, 96 * 1024 * 1024))


def _pick_tile_s(S, B, Cin, Cout, K, itemsize, budget):
    """Largest 8-row-multiple sequence tile that fits the VMEM budget."""
    # Grid-invariant VMEM (weight pages + bias + halo blocks), counted x2 to be safe.
    fixed = 2 * (K * Cin * Cout * itemsize + 4 * Cout
                 + 2 * (K - 1) * Cin * itemsize)
    # Per-sequence-row VMEM: double-buffered x/out tiles + in-kernel working set
    # (sanitized tile, shifted tap views, f32 accumulator + epilogue).
    per_row = Cin * itemsize * (2 + K) + Cout * (2 * itemsize + 8)
    usable = budget * 3 // 4 - fixed           # leave 25% headroom for temporaries
    cap = max(_SUBLANE, (usable // per_row) // _SUBLANE * _SUBLANE)
    tile_s = max(_SUBLANE, min(_round_up(S, _SUBLANE), _MAX_TILE_S, cap))
    # Keep at least two grid steps when possible so both v7x TensorCores get work.
    if B * _cdiv(S, tile_s) < 2 and S > _SUBLANE:
        tile_s = max(_SUBLANE, _round_up(_cdiv(S, 2), _SUBLANE))
    return tile_s


def _sanitize(v):
    # nan_to_num(nan=0.0, posinf=1.0, neginf=-1.0) in the native dtype.
    v = jnp.where(jnp.isnan(v), 0.0, v)
    v = jnp.where(v == jnp.inf, 1.0, v)
    v = jnp.where(v == -jnp.inf, -1.0, v)
    return v


def _conv_bn_lrelu_kernel(x_ref, halo_ref, w_ref, b_ref, o_ref, *,
                          tile_s, pad, kernel_size, neg_slope, seq_len, ragged):
    # x_ref:    (1, tile_s, Cin)      current sequence tile (native dtype)
    # halo_ref: (1, 1, 2*pad, Cin)    prev-tile tail rows + next-tile head rows
    # w_ref:    (K, Cin, Cout)        conv weight with BN scale folded in (VMEM resident)
    # b_ref:    (1, Cout)             fused BN/conv bias, f32 (VMEM resident)
    # o_ref:    (1, tile_s, Cout)
    x_t = _sanitize(x_ref[0])                    # (tile_s, Cin)

    if ragged:
        # Last tile may be ragged: rows past the sequence end hold stale DMA data.
        # Zero them so the +off taps see the conv's zero padding, not garbage.
        s = pl.program_id(1)
        rows_valid = jnp.minimum(tile_s, seq_len - s * tile_s)
        row_ids = lax.broadcasted_iota(jnp.int32, (tile_s, 1), 0)
        x_t = jnp.where(row_ids < rows_valid, x_t, 0)

    halo = _sanitize(halo_ref[0, 0])             # (2*pad, Cin)
    hp = halo[:pad, :]                           # rows [-pad, 0)  (zeros at seq start)
    hn = halo[pad:, :]                           # rows [T, T+pad) (zeros at seq end)

    # Center tap: no shift at all. Remaining taps: one shifted view + one
    # accumulating MXU matmul each (f32 accumulator, native-dtype operands).
    acc = jnp.dot(x_t, w_ref[pad], preferred_element_type=jnp.float32)
    for k in range(kernel_size):
        off = k - pad
        if off == 0:
            continue
        if off < 0:
            v = jnp.concatenate([hp[pad + off:, :], x_t[:tile_s + off, :]], axis=0)
        else:
            v = jnp.concatenate([x_t[off:, :], hn[:off, :]], axis=0)
        acc = acc + jnp.dot(v, w_ref[k], preferred_element_type=jnp.float32)

    # Fused (folded) BatchNorm bias + LeakyReLU epilogue; store in output dtype.
    y = acc + b_ref[...]
    y = jnp.where(y > 0, y, neg_slope * y)
    o_ref[0] = y.astype(o_ref.dtype)


def conv_layer_forward(x, weight, conv_bias, gamma, beta, running_mean,
                       running_var, *, kernel_size=3, dilation=1, eps=1e-5,
                       neg_slope=0.01, dropout=0.2, tile_s=None):
    """ConvLayer.forward (eval mode): [B, S, Cin] -> [B, S, Cout]."""
    del dropout  # eval-mode Dropout is identity
    if dilation != 1:
        # TODO(synk): dilation > 1 changes the PyTorch output length (padding is
        # fixed at (K-1)//2); not supported by this kernel.
        raise NotImplementedError("dilation != 1 is not supported")
    if kernel_size < 3 or kernel_size % 2 == 0:
        # TODO(synk): even / size-1 kernels have different 'same' semantics.
        raise NotImplementedError("only odd kernel_size >= 3 is supported")

    B, S, Cin = x.shape
    Cout = weight.shape[0]                      # PyTorch conv weight: (Cout, Cin, K)
    K = kernel_size
    pad = (K - 1) // 2

    budget = _vmem_budget()
    if tile_s is None:
        tile_s = _pick_tile_s(S, B, Cin, Cout, K, x.dtype.itemsize, budget)
    if tile_s % _SUBLANE != 0:
        raise ValueError("tile_s must be a multiple of 8")

    n_tiles = pl.cdiv(S, tile_s)
    ragged = (S % tile_s) != 0

    # Tiny per-tile halo rows: previous tile's last `pad` rows and next tile's
    # first `pad` rows; zeros past the sequence ends (== the conv zero padding).
    t = jnp.arange(n_tiles)
    rows = jnp.concatenate(
        [t[:, None] * tile_s - pad + jnp.arange(pad)[None, :],
         (t[:, None] + 1) * tile_s + jnp.arange(pad)[None, :]], axis=1)   # (n_tiles, 2*pad)
    valid = (rows >= 0) & (rows < S)
    halo = jnp.take(x, jnp.clip(rows, 0, S - 1).reshape(-1), axis=1)      # (B, n_tiles*2*pad, Cin)
    halo = jnp.where(valid.reshape(-1)[None, :, None], halo, 0)
    halo = halo.reshape(B, n_tiles, 2 * pad, Cin).astype(x.dtype)

    # BatchNorm (eval) folded host-side: scale into the conv weight (per output
    # channel, in f32, then cast to the compute dtype), shift into a single bias.
    scale = (gamma / jnp.sqrt(running_var + eps)).astype(jnp.float32)
    bias = (beta + (conv_bias - running_mean) * scale).astype(jnp.float32)[None, :]
    w_kio = jnp.transpose(weight, (2, 1, 0)).astype(jnp.float32)          # (K, Cin, Cout)
    w_kio = (w_kio * scale[None, None, :]).astype(x.dtype)

    kernel = functools.partial(_conv_bn_lrelu_kernel, tile_s=tile_s, pad=pad,
                               kernel_size=K, neg_slope=neg_slope,
                               seq_len=S, ragged=ragged)

    out = pl.pallas_call(
        kernel,
        out_shape=jax.ShapeDtypeStruct((B, S, Cout), x.dtype),
        grid_spec=pltpu.PrefetchScalarGridSpec(
            num_scalar_prefetch=0,
            grid=(B, n_tiles),
            in_specs=[
                pl.BlockSpec((1, tile_s, Cin), lambda b, s: (b, s, 0)),
                pl.BlockSpec((1, 1, 2 * pad, Cin), lambda b, s: (b, s, 0, 0)),
                # Grid-invariant operands: whole array resident in VMEM, no
                # per-step double buffering.
                pl.BlockSpec(memory_space=pltpu.MemorySpace.VMEM),   # weight (K,Cin,Cout)
                pl.BlockSpec(memory_space=pltpu.MemorySpace.VMEM),   # bias   (1,Cout)
            ],
            out_specs=pl.BlockSpec((1, tile_s, Cout), lambda b, s: (b, s, 0)),
        ),
        compiler_params=pltpu.CompilerParams(
            dimension_semantics=("parallel", "parallel"),
            vmem_limit_bytes=budget,
        ),
    )(x, halo, w_kio, bias)

    return out


def _reference(x, weight, conv_bias, gamma, beta, running_mean, running_var,
               *, kernel_size=3, eps=1e-5, neg_slope=0.01):
    """Plain-JAX reference (same math) for a correctness check."""
    x = jnp.nan_to_num(x, nan=0.0, posinf=1.0, neginf=-1.0)
    pad = (kernel_size - 1) // 2
    x_pad = jnp.pad(x, ((0, 0), (pad, pad), (0, 0)))
    S = x.shape[1]
    y = jnp.zeros((x.shape[0], S, weight.shape[0]), jnp.float32)
    for k in range(kernel_size):
        y = y + jnp.einsum("bsc,oc->bso", x_pad[:, k:k + S, :], weight[:, :, k])
    y = y + conv_bias[None, None, :]
    y = (y - running_mean) / jnp.sqrt(running_var + eps) * gamma + beta
    return jnp.where(y > 0, y, neg_slope * y).astype(x.dtype)


if __name__ == "__main__":
    B, S, Cin, Cout, K = 2, 16, 4, 8, 3

    key = jax.random.PRNGKey(0)
    kx, kw, kb, kg, kbeta, km, kv = jax.random.split(key, 7)

    x = jax.random.normal(kx, (B, S, Cin), dtype=jnp.float32)
    # exercise the nan_to_num path
    x = x.at[0, 3, 1].set(jnp.nan).at[1, 5, 0].set(jnp.inf).at[1, 7, 2].set(-jnp.inf)

    # Conv1d params: kaiming_normal_(fan_out, leaky_relu) -> std = gain/sqrt(fan_out)
    fan_out = Cout * K
    gain = (2.0 / (1.0 + 0.01 ** 2)) ** 0.5
    std = gain / (fan_out ** 0.5)
    weight = std * jax.random.normal(kw, (Cout, Cin, K), dtype=jnp.float32)
    conv_bias = 0.1 * jax.random.normal(kb, (Cout,), dtype=jnp.float32)

    # BatchNorm1d params / running stats (deterministic, non-trivial).
    gamma = 1.0 + 0.1 * jax.random.normal(kg, (Cout,), dtype=jnp.float32)
    beta = 0.1 * jax.random.normal(kbeta, (Cout,), dtype=jnp.float32)
    running_mean = 0.05 * jax.random.normal(km, (Cout,), dtype=jnp.float32)
    running_var = jnp.abs(1.0 + 0.1 * jax.random.normal(kv, (Cout,),
                                                        dtype=jnp.float32))

    ref = _reference(x, weight, conv_bias, gamma, beta, running_mean, running_var)

    # Multi-tile path: grid = (B, 2) exercises the S-tiling + halo logic.
    out_tiled = conv_layer_forward(x, weight, conv_bias, gamma, beta,
                                   running_mean, running_var, tile_s=8)
    out_tiled = jax.block_until_ready(out_tiled)
    assert out_tiled.shape == (B, S, Cout)
    assert jnp.allclose(out_tiled, ref, atol=1e-5, rtol=1e-5), "tiled mismatch"

    # Auto-tile path (one tile per batch element at this size).
    out_auto = jax.block_until_ready(
        conv_layer_forward(x, weight, conv_bias, gamma, beta,
                           running_mean, running_var))
    assert out_auto.shape == (B, S, Cout)
    assert jnp.allclose(out_auto, ref, atol=1e-5, rtol=1e-5), "auto mismatch"

    # Ragged sequence (S not a multiple of tile_s): no host-side S padding,
    # output emitted directly at (B, S, Cout).
    x_rag = x[:, :13, :]
    ref_rag = _reference(x_rag, weight, conv_bias, gamma, beta,
                         running_mean, running_var)
    out_rag = jax.block_until_ready(
        conv_layer_forward(x_rag, weight, conv_bias, gamma, beta,
                           running_mean, running_var, tile_s=8))
    assert out_rag.shape == (B, 13, Cout)
    assert jnp.allclose(out_rag, ref_rag, atol=1e-5, rtol=1e-5), "ragged mismatch"

    # bf16 inputs stay bf16 on the MXU (f32 accumulation); loose tolerance vs f32 ref.
    out_bf16 = jax.block_until_ready(
        conv_layer_forward(x.astype(jnp.bfloat16), weight, conv_bias, gamma,
                           beta, running_mean, running_var, tile_s=8))
    assert out_bf16.dtype == jnp.bfloat16
    assert jnp.allclose(out_bf16.astype(jnp.float32), ref,
                        atol=0.1, rtol=0.1), "bf16 mismatch"

    print("KERNEL_OK")
</pallas_src>

<mosaic_0001>
module attributes {stable_mosaic.version = 11 : i64} {
  func.func @_conv_bn_lrelu_kernel(%arg0: i32, %arg1: i32, %arg2: memref<1x8x4xf32, #tpu.memory_space<vmem>>, %arg3: memref<1x1x2x4xf32, #tpu.memory_space<vmem>>, %arg4: memref<3x4x8xf32, #tpu.memory_space<vmem>>, %arg5: memref<1x8xf32, #tpu.memory_space<vmem>>, %arg6: memref<1x8x8xf32, #tpu.memory_space<vmem>>) attributes {dimension_semantics = [#tpu.dimension_semantics<parallel>, #tpu.dimension_semantics<parallel>], iteration_bounds = array<i64: 2, 2>, scalar_prefetch = 0 : i64, scratch_operands = 0 : i64, tpu.core_type = #tpu.core_type<tc>, window_params = [{transform_indices = @transform_0, window_bounds = array<i64: 1, 8, 4>}, {transform_indices = @transform_1, window_bounds = array<i64: 1, 1, 2, 4>}, {pipeline_mode = #tpu.pipeline_mode<synchronous>, transform_indices = @transform_2, window_bounds = array<i64: 3, 4, 8>}, {pipeline_mode = #tpu.pipeline_mode<synchronous>, transform_indices = @transform_3, window_bounds = array<i64: 1, 8>}, {transform_indices = @transform_4, window_bounds = array<i64: 1, 8, 8>}]} {
    %c0 = arith.constant 0 : index
    %c0_0 = arith.constant 0 : index
    %c0_1 = arith.constant 0 : index
    %0 = vector.load %arg2[%c0, %c0_0, %c0_1] : memref<1x8x4xf32, #tpu.memory_space<vmem>>, vector<1x8x4xf32>
    %1 = vector.shape_cast %0 : vector<1x8x4xf32> to vector<8x4xf32>
    %2 = arith.cmpf one, %1, %1 : vector<8x4xf32>
    %cst = arith.constant 0.000000e+00 : f32
    %3 = vector.broadcast %cst : f32 to vector<8x4xf32>
    %4 = arith.select %2, %3, %1 : vector<8x4xi1>, vector<8x4xf32>
    %cst_2 = arith.constant 0x7F800000 : f32
    %5 = vector.broadcast %cst_2 : f32 to vector<8x4xf32>
    %6 = arith.cmpf oeq, %4, %5 : vector<8x4xf32>
    %cst_3 = arith.constant 1.000000e+00 : f32
    %7 = vector.broadcast %cst_3 : f32 to vector<8x4xf32>
    %8 = arith.select %6, %7, %4 : vector<8x4xi1>, vector<8x4xf32>
    %cst_4 = arith.constant 0xFF800000 : f32
    %9 = vector.broadcast %cst_4 : f32 to vector<8x4xf32>
    %10 = arith.cmpf oeq, %8, %9 : vector<8x4xf32>
    %cst_5 = arith.constant -1.000000e+00 : f32
    %11 = vector.broadcast %cst_5 : f32 to vector<8x4xf32>
    %12 = arith.select %10, %11, %8 : vector<8x4xi1>, vector<8x4xf32>
    %c0_6 = arith.constant 0 : index
    %c0_7 = arith.constant 0 : index
    %c0_8 = arith.constant 0 : index
    %c0_9 = arith.constant 0 : index
    %13 = vector.load %arg3[%c0_6, %c0_7, %c0_8, %c0_9] : memref<1x1x2x4xf32, #tpu.memory_space<vmem>>, vector<1x1x2x4xf32>
    %14 = vector.shape_cast %13 : vector<1x1x2x4xf32> to vector<2x4xf32>
    %15 = arith.cmpf one, %14, %14 : vector<2x4xf32>
    %cst_10 = arith.constant 0.000000e+00 : f32
    %16 = vector.broadcast %cst_10 : f32 to vector<2x4xf32>
    %17 = arith.select %15, %16, %14 : vector<2x4xi1>, vector<2x4xf32>
    %cst_11 = arith.constant 0x7F800000 : f32
    %18 = vector.broadcast %cst_11 : f32 to vector<2x4xf32>
    %19 = arith.cmpf oeq, %17, %18 : vector<2x4xf32>
    %cst_12 = arith.constant 1.000000e+00 : f32
    %20 = vector.broadcast %cst_12 : f32 to vector<2x4xf32>
    %21 = arith.select %19, %20, %17 : vector<2x4xi1>, vector<2x4xf32>
    %cst_13 = arith.constant 0xFF800000 : f32
    %22 = vector.broadcast %cst_13 : f32 to vector<2x4xf32>
    %23 = arith.cmpf oeq, %21, %22 : vector<2x4xf32>
    %cst_14 = arith.constant -1.000000e+00 : f32
    %24 = vector.broadcast %cst_14 : f32 to vector<2x4xf32>
    %25 = arith.select %23, %24, %21 : vector<2x4xi1>, vector<2x4xf32>
    %26 = vector.extract_strided_slice %25 {offsets = [0, 0], sizes = [1, 4], strides = [1, 1]} : vector<2x4xf32> to vector<1x4xf32>
    %27 = vector.extract_strided_slice %25 {offsets = [1, 0], sizes = [1, 4], strides = [1, 1]} : vector<2x4xf32> to vector<1x4xf32>
    %c1 = arith.constant 1 : index
    %c0_15 = arith.constant 0 : index
    %c0_16 = arith.constant 0 : index
    %28 = vector.load %arg4[%c1, %c0_15, %c0_16] : memref<3x4x8xf32, #tpu.memory_space<vmem>>, vector<1x4x8xf32>
    %29 = vector.shape_cast %28 : vector<1x4x8xf32> to vector<4x8xf32>
    %cst_17 = arith.constant dense<0.000000e+00> : vector<8x8xf32>
    %30 = tpu.matmul %12, %29, %cst_17 {dimension_numbers = #tpu.dot_dimension_numbers<[1], [0], [0], [1], [0, 0, 1, 1], [], []>} : vector<8x4xf32>, vector<4x8xf32>, vector<8x8xf32> -> vector<8x8xf32>
    %31 = vector.extract_strided_slice %12 {offsets = [0, 0], sizes = [7, 4], strides = [1, 1]} : vector<8x4xf32> to vector<7x4xf32>
    %32 = tpu.concatenate %26, %31 in 0 : vector<1x4xf32>, vector<7x4xf32> -> vector<8x4xf32>
    %c0_18 = arith.constant 0 : index
    %c0_19 = arith.constant 0 : index
    %c0_20 = arith.constant 0 : index
    %33 = vector.load %arg4[%c0_18, %c0_19, %c0_20] : memref<3x4x8xf32, #tpu.memory_space<vmem>>, vector<1x4x8xf32>
    %34 = vector.shape_cast %33 : vector<1x4x8xf32> to vector<4x8xf32>
    %cst_21 = arith.constant dense<0.000000e+00> : vector<8x8xf32>
    %35 = tpu.matmul %32, %34, %cst_21 {dimension_numbers = #tpu.dot_dimension_numbers<[1], [0], [0], [1], [0, 0, 1, 1], [], []>} : vector<8x4xf32>, vector<4x8xf32>, vector<8x8xf32> -> vector<8x8xf32>
    %36 = arith.addf %30, %35 : vector<8x8xf32>
    %37 = vector.extract_strided_slice %12 {offsets = [1, 0], sizes = [7, 4], strides = [1, 1]} : vector<8x4xf32> to vector<7x4xf32>
    %38 = tpu.concatenate %37, %27 in 0 : vector<7x4xf32>, vector<1x4xf32> -> vector<8x4xf32>
    %c2 = arith.constant 2 : index
    %c0_22 = arith.constant 0 : index
    %c0_23 = arith.constant 0 : index
    %39 = vector.load %arg4[%c2, %c0_22, %c0_23] : memref<3x4x8xf32, #tpu.memory_space<vmem>>, vector<1x4x8xf32>
    %40 = vector.shape_cast %39 : vector<1x4x8xf32> to vector<4x8xf32>
    %cst_24 = arith.constant dense<0.000000e+00> : vector<8x8xf32>
    %41 = tpu.matmul %38, %40, %cst_24 {dimension_numbers = #tpu.dot_dimension_numbers<[1], [0], [0], [1], [0, 0, 1, 1], [], []>} : vector<8x4xf32>, vector<4x8xf32>, vector<8x8xf32> -> vector<8x8xf32>
    %42 = arith.addf %36, %41 : vector<8x8xf32>
    %c0_25 = arith.constant 0 : index
    %c0_26 = arith.constant 0 : index
    %43 = vector.load %arg5[%c0_25, %c0_26] : memref<1x8xf32, #tpu.memory_space<vmem>>, vector<1x8xf32>
    %44 = vector.broadcast %43 : vector<1x8xf32> to vector<8x8xf32>
    %45 = arith.addf %42, %44 : vector<8x8xf32>
    %cst_27 = arith.constant 0.000000e+00 : f32
    %46 = vector.broadcast %cst_27 : f32 to vector<8x8xf32>
    %47 = arith.cmpf ogt, %45, %46 : vector<8x8xf32>
    %cst_28 = arith.constant 0.00999999977 : f32
    %48 = vector.broadcast %cst_28 : f32 to vector<8x8xf32>
    %49 = arith.mulf %48, %45 : vector<8x8xf32>
    %50 = arith.select %47, %45, %49 : vector<8x8xi1>, vector<8x8xf32>
    %c0_29 = arith.constant 0 : index
    %c0_30 = arith.constant 0 : index
    %c0_31 = arith.constant 0 : index
    %51 = vector.load %arg6[%c0_29, %c0_30, %c0_31] : memref<1x8x8xf32, #tpu.memory_space<vmem>>, vector<1x8x8xf32>
    %52 = vector.shape_cast %51 : vector<1x8x8xf32> to vector<8x8xf32>
    %53 = vector.shape_cast %50 : vector<8x8xf32> to vector<1x8x8xf32>
    tpu.vector_store %arg6[%c0_29, %c0_30, %c0_31], %53 {strides = array<i32>} : memref<1x8x8xf32, #tpu.memory_space<vmem>>, vector<1x8x8xf32>,
    return
  }
  func.func @transform_0(%arg0: i32, %arg1: i32) -> (i32, i32, i32) {
    %c0_i32 = arith.constant 0 : i32
    %c0_i32_0 = arith.constant 0 : i32
    return %arg0, %arg1, %c0_i32 : i32, i32, i32
  }
  func.func @transform_1(%arg0: i32, %arg1: i32) -> (i32, i32, i32, i32) {
    %c0_i32 = arith.constant 0 : i32
    %c0_i32_0 = arith.constant 0 : i32
    %c0_i32_1 = arith.constant 0 : i32
    return %arg0, %arg1, %c0_i32, %c0_i32_0 : i32, i32, i32, i32
  }
  func.func @transform_2(%arg0: i32, %arg1: i32) -> (i32, i32, i32) {
    %c0_i32 = arith.constant 0 : i32
    %c0_i32_0 = arith.constant 0 : i32
    %c0_i32_1 = arith.constant 0 : i32
    %c0_i32_2 = arith.constant 0 : i32
    return %c0_i32, %c0_i32_0, %c0_i32_1 : i32, i32, i32
  }
  func.func @transform_3(%arg0: i32, %arg1: i32) -> (i32, i32) {
    %c0_i32 = arith.constant 0 : i32
    %c0_i32_0 = arith.constant 0 : i32
    %c0_i32_1 = arith.constant 0 : i32
    return %c0_i32, %c0_i32_0 : i32, i32
  }
  func.func @transform_4(%arg0: i32, %arg1: i32) -> (i32, i32, i32) {
    %c0_i32 = arith.constant 0 : i32
    %c0_i32_0 = arith.constant 0 : i32
    return %arg0, %arg1, %c0_i32 : i32, i32, i32
  }
}

</mosaic_0001>

<bundles_post_ra>
// kernel: tpu_custom_call.1
= control target key start
LH: loop header
LB: loop body
LE: loop exit
PB: predicated region body
PF: predicated region fallthrough
CT: control target
= control target key end

     0   :  { %s790_s15 = smov 0   ;;  %s792_s16 = smov 0   ;;  %s877_s0 = inlined_call_operand.vmem [shape: f32[2,16,4], index: 0, kind: input, shape index: {}]   ;;  %s878_s1 = inlined_call_operand.vmem [shape: f32[2,2,2,4], index: 1, kind: input, shape index: {}]   ;;  %s879_s2 = inlined_call_operand.vmem [shape: f32[3,4,8], index: 2, kind: input, shape index: {}]   ;;  %s880_s3 = inlined_call_operand.vmem [shape: f32[1,8], index: 3, kind: input, shape index: {}]   ;;  %s881_s4 = inlined_call_operand.vmem [shape: f32[2,16,8], index: 4, kind: output, shape index: {}]  }
   0x1   :  { %s794_s17 = smov 0   ;;  %s796_s18 = smov 0  }
   0x2   :  { %s798_s19 = smov 0  }
   0x3 LB: > { %s23_s20 = sadd.s32 1, %s753_s17  ;;  %s26_s21 = sadd.s32 1, %s757_s18  ;;  %s761_s19 = sphi %s798_s19, %s14_s19   ;;  %s757_s18 = sphi %s796_s18, %s885_s18   ;;  %s753_s17 = sphi %s794_s17, %s884_s17   ;;  %s749_s16 = sphi %s792_s16, %s883_s16   ;;  %s745_s15 = sphi %s790_s15, %s882_s15  }
   0x4   : > { %p24_p0 = scmp.ge.s32.totalorder %s23_s20, 2  ;;  %p642_p1 = scmp.ge.s32.totalorder %s761_s19, 1 }
   0x5   : > { %p196_p2 = scmp.lt.s32.totalorder %s761_s19, 5 }
   0x6   : > { %s887_s20 = smov (%p24_p0, %s23_s20), 0  ;;  %s889_s21 = smov (!%p24_p0, %s26_s21), %s757_s18 }
   0x7   : > { %p197_p3 = pnand %p642_p1, %p196_p2  ;;  %p28_p4 = scmp.ge.s32.totalorder %s889_s21, 2 }
   0x8   : > { %v281_v0 = vld [vmem:[%s879_s2] sm:$0xf] (!%p197_p3)  ;;  %vm286_vm0 = vcmask (!%p197_p3), 1043456   ;;  %p236_p5 = scmp.lt.s32.totalorder (!%p197_p3), %s749_s16, 1  ;;  %v763_v1 = vmov (!%p197_p3), 0.0   ;;  %p238_p6 = scmp.lt.s32.totalorder (!%p197_p3), %s745_s15, 1 }
   0x9   : > { %s891_s21 = smov (%p28_p4, %s889_s21), 0  ;;  %200 = sbr.rel (%p197_p3) target bundleno = 255 (0xff), region = 36 }
   0xa   : > { %666 = vmatprep.subr.mxu0 (!%p197_p3), %v763_v1  ;;  %671 = vmatprep.subr.mxu1 (!%p197_p3), %v763_v1  ;;  %v649_v2 = vld [vmem:[%s879_s2 + $0x4] sm:$0xf] (!%p197_p3)  ;;  %vm764_vm1 = vmmov (!%p197_p3), 0   ;;  %vm282_vm6 = vcmask (!%p197_p3), 31744   ;;  %vm279_vm9 = vcmask (!%p197_p3), 1040384   ;;  %vm440_vm10 = vcmask (!%p197_p3), 1046528  }
   0xb   : > { %667 = vmatpush3.msk.msra.mxu0 (!%p197_p3), %vm286_vm0, %v281_v0  ;;  %668 = vmatprep.mubr.msk.f32.mxu0 (!%p197_p3), %vm764_vm1, %v763_v1  ;;  %v654_v14 = vld [vmem:[%s879_s2 + $0x8] sm:$0xf] (!%p197_p3)  ;;  %v657_v23 = vld [vmem:[%s880_s3] ss:$0 sm:$0xff] (!%p197_p3)  ;;  %vm532_vm12 = vcmask (!%p197_p3), 64512  }
   0xc   : > { %672 = vmatpush3.msk.msra.mxu1 (!%p197_p3), %vm286_vm0, %v649_v2  ;;  %673 = vmatprep.mubr.msk.f32.mxu1 (!%p197_p3), %vm764_vm1, %v763_v1 }
   0xd   : > { %676 = vmatprep.subr.mxu0 (!%p197_p3), %v763_v1 }
  0x10   : > { %s893_s16 = smov (!%p236_p5, %s749_s16), 1  ;;  %s895_s15 = smov (!%p238_p6, %s745_s15), 1 }
  0x11   : > { %s643_s26 = sshll.u32 %s893_s16, 1 }
  0x12   : > { %s834_s27 = sadd.s32 %s643_s26, %s895_s15 }
  0x13   : > { %s644_s28 = sshll.u32 %s834_s27, 3  ;;  %s646_s29 = sshll.u32 %s834_s27, 1 }
  0x14   : > { %s243_s6 = scalar_lea.vmem %s877_s0, %s644_s28  ;;  %s251_s9 = scalar_lea.vmem %s878_s1, %s646_s29 }
  0x15   : > { %v260_v3 = vld [vmem:[%s243_s6] sm:$0xff]  ;;  %s259_s16 = scalar_lea.vmem %s881_s4, %s644_s28 }
  0x16   : > { %v267_v4 = vld [vmem:[%s251_s9] sm:$0x3]  ;;  %vm261_vm2 = vcmp.ne.f32.partialorder %v260_v3, %v260_v3 }
  0x17   : > { %vm268_vm3 = vcmp.ne.f32.partialorder %v267_v4, %v267_v4  ;;  %v262_v5 = vsel %vm261_vm2, 0.0, %v260_v3 }
  0x18   : > { %v269_v6 = vsel %vm268_vm3, 0.0, %v267_v4  ;;  %vm263_vm4 = vcmp.eq.f32.partialorder %v262_v5, inf }
  0x19   : > { %vm270_vm5 = vcmp.eq.f32.partialorder %v269_v6, inf  ;;  %v264_v7 = vsel %vm263_vm4, 1.0, %v262_v5 }
  0x1a   : > { %v271_v8 = vsel %vm270_vm5, 1.0, %v269_v6  ;;  %vm265_vm7 = vcmp.eq.f32.partialorder %v264_v7, -inf }
  0x1b   : > { %vm272_vm8 = vcmp.eq.f32.partialorder %v271_v8, -inf  ;;  %v266_v9 = vsel %vm265_vm7, -1.0, %v264_v7 }
  0x1c   : > { %v273_v10 = vsel %vm272_vm8, -1.0, %v271_v8  ;;  %v277_v11 = vrot.slane %v266_v9, 7  ;;  %674 = vmatmul.mubr.msk.f32.vlgmr.msra.gmra.mrb[0].mxu1 %vm282_vm6, %v266_v9  ;;  %v435_v13 = vrot.slane %v266_v9, 1 }
  0x1d   : > { %v438_v12 = vrot.slane %v273_v10, 2 }
  0x1e   : > { %v280_v15 = vsel %vm279_vm9, %v273_v10, %v277_v11 }
  0x1f   : > { %669 = vmatmul.mubr.msk.f32.vlgmr.msra.gmra.mrb[0].mxu0 %vm282_vm6, %v280_v15  ;;  %v441_v16 = vsel %vm440_vm10, %v435_v13, %v438_v12 }
  0x20   : > { %677 = vmatpush3.msk.msra.mxu0 %vm286_vm0, %v654_v14  ;;  %678 = vmatprep.mubr.msk.f32.mxu0 %vm764_vm1, %v763_v1 }
  0x23   : > { %679 = vmatmul.mubr.msk.f32.vlgmr.msra.gmra.mrb[2].mxu0 %vm282_vm6, %v441_v16 }
  0xef   : > { %v431_v17 = vpop.f32.mrb[0].mxu1 }
  0xf0   : > { %v675_v18 = vpop.f32.mrb[1].mxu1 }
  0xf2   : > { %v356_v19 = vpop.f32.mrb[0].mxu0 }
  0xf3   : > { %v432_v20 = vadd.f32 %v431_v17, %v356_v19  ;;  %v670_v21 = vpop.f32.mrb[1].mxu0 }
  0xf6   : > { %v516_v22 = vpop.f32.mrb[2].mxu0 }
  0xf7   : > { %v520_v24 = vadd.f32 %v516_v22, %v432_v20  ;;  %v680_v25 = vpop.f32.mrb[3].mxu0 }
  0xf9   : > { %v528_v26 = vadd.f32 %v657_v23, %v520_v24 }
  0xfb   : > { %vm529_vm11 = vcmp.gt.f32.partialorder %v528_v26, 0.0  ;;  %v530_v27 = vmul.f32 0.01, %v528_v26 }
  0xfd   : > { %v531_v28 = vsel %vm529_vm11, %v528_v26, %v530_v27 }
  0xfe   : > { %533 = vst.msk [vmem:[%s259_s16] sm:$0xff] %vm532_vm12, %v531_v28 }
  0xff PF: > { %s14_s19 = sadd.s32 1, %s761_s19   ;;  %s882_s15 = smov %s753_s17 }
 0x100   : > { %p11_p7 = scmp.ge.s32.totalorder %s14_s19, 6   ;;  %s883_s16 = smov %s757_s18 }
 0x101   : > { %s884_s17 = smov %s887_s20  ;;  %s885_s18 = smov %s891_s21 }
 0x102   :  { %13 = sbr.rel (!%p11_p7) target bundleno = 3 (0x3), region = 71 }

</bundles_post_ra>
